<compile_context>
chip_gen: v7x
topology: tpu7x:2x2x1
jax: 0.10.0
libtpu: 0.0.40
codegen_flags: <defaults>
</compile_context>

<pallas_src>
import jax
import jax.numpy as jnp
from jax import lax
from jax.experimental import pallas as pl
from jax.experimental.pallas import tpu as pltpu


def _sa_pair_kernel(x1_ref, x2_ref, w_ref, o1_ref, o2_ref):
    """Single-head self-attention + residual for two feature sets, in VMEM.

    x1_ref: (N1, C) f32 tokens of feature set 1.
    x2_ref: (N2, C) f32 tokens of feature set 2.
    w_ref:  (3, C, C) bf16 packed [Wq*scale, Wk, Wv] projection weights.
    o1_ref/o2_ref: (Ni, C) f32 = x_i + softmax((x_i Wq*scale)(x_i Wk)^T)(x_i Wv)
    """
    # Leading-axis indexing only: no sub-128-lane column slicing -> no XLU
    # relayouts even when C is not a multiple of 128.
    w_q = w_ref[0]          # (C, C) bf16, softmax scale pre-folded
    w_k = w_ref[1]          # (C, C) bf16
    w_v = w_ref[2]          # (C, C) bf16

    def _one(x_ref, o_ref):
        # bf16 copy feeds the MXU; it is only live through the three dots.
        x_bf = x_ref[...].astype(jnp.bfloat16)

        q = jnp.dot(x_bf, w_q, preferred_element_type=jnp.float32)   # (N, C)
        k = jnp.dot(x_bf, w_k, preferred_element_type=jnp.float32)   # (N, C)
        v = jnp.dot(x_bf, w_v, preferred_element_type=jnp.float32)   # (N, C)

        # Attention scores: contract on the last axes (no explicit transpose),
        # bf16 operands, f32 accumulation on the MXU.
        s = lax.dot_general(
            q.astype(jnp.bfloat16), k.astype(jnp.bfloat16),
            (((1,), (1,)), ((), ())),
            preferred_element_type=jnp.float32,
        )                                                             # (N, N)

        # Numerically-stable softmax; all elementwise math in f32.
        s = s - jnp.max(s, axis=-1, keepdims=True)
        p = jnp.exp(s)
        p = p / jnp.sum(p, axis=-1, keepdims=True)   # exact divide (N elems/row)
        # attn_drop / proj_drop are identity in eval mode.

        out = jnp.dot(p.astype(jnp.bfloat16), v.astype(jnp.bfloat16),
                      preferred_element_type=jnp.float32)             # (N, C)

        # Residual: re-read the f32 input from VMEM here instead of keeping the
        # initial load live across both matmuls and the softmax.
        o_ref[...] = (x_ref[...] + out).astype(o_ref.dtype)

    _one(x1_ref, o1_ref)
    _one(x2_ref, o2_ref)


def _per_set_cost(n, c):
    qkv = 2 * n * c * (3 * c)     # three (N,C)x(C,C) projections
    scores = 2 * n * n * c        # q k^T
    pv = 2 * n * n * c            # p v
    soft = 4 * n * n              # max/sub/exp-adjacent elementwise
    resid = n * c
    return qkv + scores + pv + soft + resid


def fused_sa_attention(x1, x2, w_qkv_packed):
    """One launch, one grid step: self-attention + residual on both sets.

    x1: (N1, C) f32, x2: (N2, C) f32, w_qkv_packed: (3, C, C) bf16 with the
    softmax scale folded into w_qkv_packed[0].
    """
    n1, c = x1.shape
    n2, c2 = x2.shape
    assert c == c2
    assert w_qkv_packed.shape == (3, c, c)

    flops = int(_per_set_cost(n1, c) + _per_set_cost(n2, c))
    transcendentals = int(n1 * n1 + n2 * n2)                  # exp
    bytes_accessed = int(2 * (n1 * c + n2 * c) * 4            # x in + out (f32)
                         + 3 * c * c * 2)                     # weight (bf16)

    out1, out2 = pl.pallas_call(
        _sa_pair_kernel,
        out_shape=(
            jax.ShapeDtypeStruct((n1, c), x1.dtype),
            jax.ShapeDtypeStruct((n2, c), x2.dtype),
        ),
        grid=(1,),
        in_specs=[
            pl.BlockSpec((n1, c), lambda i: (0, 0)),
            pl.BlockSpec((n2, c), lambda i: (0, 0)),
            # Packed (3, C, C) qkv weight, DMA'd once (single grid step).
            pl.BlockSpec((3, c, c), lambda i: (0, 0, 0)),
        ],
        out_specs=(
            pl.BlockSpec((n1, c), lambda i: (0, 0)),
            pl.BlockSpec((n2, c), lambda i: (0, 0)),
        ),
        compiler_params=pltpu.CompilerParams(
            dimension_semantics=("arbitrary",),
        ),
        cost_estimate=pl.CostEstimate(
            flops=flops,
            transcendentals=transcendentals,
            bytes_accessed=bytes_accessed,
        ),
    )(x1, x2, w_qkv_packed)
    return out1, out2


def attention_forward(class1_features, class2_features, params, attn_type="SA"):
    """Mirrors Attention.forward for the default 'SA' path."""
    assert attn_type == "SA", "only the default 'SA' path is implemented"
    return fused_sa_attention(class1_features, class2_features,
                              params["w_qkv_packed"])


if __name__ == "__main__":
    key = jax.random.PRNGKey(0)
    dim = 32          # C
    num_heads = 1     # module default
    n1, n2 = 8, 16    # unequal token counts: handled in one launch, no padding

    k1, k2, k3, k4 = jax.random.split(key, 4)
    class1 = jax.random.normal(k1, (n1, dim), jnp.float32)
    class2 = jax.random.normal(k2, (n2, dim), jnp.float32)

    # nn.Linear(dim, 3*dim, bias=False): weight shape (3*dim, dim), y = x @ W^T
    w_qkv = jax.random.normal(k3, (3 * dim, dim), jnp.float32) * 0.02
    # nn.Linear(dim, dim) 'proj' — initialized per __init__ but unused in forward.
    w_proj = jax.random.normal(k4, (dim, dim), jnp.float32) * 0.02
    b_proj = jnp.zeros((dim,), jnp.float32)

    head_dim = dim // num_heads
    scale = head_dim ** (-0.5)

    # Pack [Wq*scale, Wk, Wv] as a (3, C, C) bf16 weight (scale folded into q,
    # bf16 at the wrapper so the weight DMA bytes are halved).
    wq = w_qkv[0:dim, :].T * scale        # (C, C), scale pre-applied
    wk = w_qkv[dim:2 * dim, :].T          # (C, C)
    wv = w_qkv[2 * dim:, :].T             # (C, C)
    params = {
        "w_qkv_packed": jnp.stack([wq, wk, wv], axis=0).astype(jnp.bfloat16)
    }                                     # (3, C, C) bf16

    out1, out2 = attention_forward(class1, class2, params, attn_type="SA")
    jax.block_until_ready((out1, out2))

    # pure-JAX f32 reference (exact scale / softmax; kernel uses bf16 MXU feed,
    # so tolerance covers bf16 rounding of the matmul operands).
    def ref(x):
        q = x @ w_qkv[0:dim, :].T
        k = x @ w_qkv[dim:2 * dim, :].T
        v = x @ w_qkv[2 * dim:, :].T
        a = jax.nn.softmax((q @ k.T) * scale, axis=-1)
        return x + a @ v

    assert out1.shape == (n1, dim) and out2.shape == (n2, dim)
    assert jnp.allclose(out1, ref(class1), atol=2e-2, rtol=2e-2)
    assert jnp.allclose(out2, ref(class2), atol=2e-2, rtol=2e-2)

    print("KERNEL_OK")
</pallas_src>

<mosaic_0001>
module attributes {stable_mosaic.version = 11 : i64} {
  func.func @_sa_pair_kernel(%arg0: i32, %arg1: memref<8x32xf32, #tpu.memory_space<vmem>>, %arg2: memref<16x32xf32, #tpu.memory_space<vmem>>, %arg3: memref<3x32x32xbf16, #tpu.memory_space<vmem>>, %arg4: memref<8x32xf32, #tpu.memory_space<vmem>>, %arg5: memref<16x32xf32, #tpu.memory_space<vmem>>) attributes {dimension_semantics = [#tpu.dimension_semantics<arbitrary>], iteration_bounds = array<i64: 1>, scalar_prefetch = 0 : i64, scratch_operands = 0 : i64, tpu.core_type = #tpu.core_type<tc>, window_params = [{pipeline_mode = #tpu.pipeline_mode<synchronous>, transform_indices = @transform_0, window_bounds = array<i64: 8, 32>}, {pipeline_mode = #tpu.pipeline_mode<synchronous>, transform_indices = @transform_1, window_bounds = array<i64: 16, 32>}, {pipeline_mode = #tpu.pipeline_mode<synchronous>, transform_indices = @transform_2, window_bounds = array<i64: 3, 32, 32>}, {pipeline_mode = #tpu.pipeline_mode<synchronous>, transform_indices = @transform_3, window_bounds = array<i64: 8, 32>}, {pipeline_mode = #tpu.pipeline_mode<synchronous>, transform_indices = @transform_4, window_bounds = array<i64: 16, 32>}]} {
    %c0 = arith.constant 0 : index
    %c0_0 = arith.constant 0 : index
    %c0_1 = arith.constant 0 : index
    %0 = vector.load %arg3[%c0, %c0_0, %c0_1] : memref<3x32x32xbf16, #tpu.memory_space<vmem>>, vector<1x32x32xbf16>
    %1 = vector.shape_cast %0 : vector<1x32x32xbf16> to vector<32x32xbf16>
    %c1 = arith.constant 1 : index
    %c0_2 = arith.constant 0 : index
    %c0_3 = arith.constant 0 : index
    %2 = vector.load %arg3[%c1, %c0_2, %c0_3] : memref<3x32x32xbf16, #tpu.memory_space<vmem>>, vector<1x32x32xbf16>
    %3 = vector.shape_cast %2 : vector<1x32x32xbf16> to vector<32x32xbf16>
    %c2 = arith.constant 2 : index
    %c0_4 = arith.constant 0 : index
    %c0_5 = arith.constant 0 : index
    %4 = vector.load %arg3[%c2, %c0_4, %c0_5] : memref<3x32x32xbf16, #tpu.memory_space<vmem>>, vector<1x32x32xbf16>
    %5 = vector.shape_cast %4 : vector<1x32x32xbf16> to vector<32x32xbf16>
    %c0_6 = arith.constant 0 : index
    %c0_7 = arith.constant 0 : index
    %6 = vector.load %arg1[%c0_6, %c0_7] : memref<8x32xf32, #tpu.memory_space<vmem>>, vector<8x32xf32>
    %7 = arith.truncf %6 : vector<8x32xf32> to vector<8x32xbf16>
    %cst = arith.constant dense<0.000000e+00> : vector<8x32xf32>
    %8 = tpu.matmul %7, %1, %cst {dimension_numbers = #tpu.dot_dimension_numbers<[1], [0], [0], [1], [0, 0, 1, 1], [], []>} : vector<8x32xbf16>, vector<32x32xbf16>, vector<8x32xf32> -> vector<8x32xf32>
    %cst_8 = arith.constant dense<0.000000e+00> : vector<8x32xf32>
    %9 = tpu.matmul %7, %3, %cst_8 {dimension_numbers = #tpu.dot_dimension_numbers<[1], [0], [0], [1], [0, 0, 1, 1], [], []>} : vector<8x32xbf16>, vector<32x32xbf16>, vector<8x32xf32> -> vector<8x32xf32>
    %cst_9 = arith.constant dense<0.000000e+00> : vector<8x32xf32>
    %10 = tpu.matmul %7, %5, %cst_9 {dimension_numbers = #tpu.dot_dimension_numbers<[1], [0], [0], [1], [0, 0, 1, 1], [], []>} : vector<8x32xbf16>, vector<32x32xbf16>, vector<8x32xf32> -> vector<8x32xf32>
    %11 = arith.truncf %8 : vector<8x32xf32> to vector<8x32xbf16>
    %12 = arith.truncf %9 : vector<8x32xf32> to vector<8x32xbf16>
    %cst_10 = arith.constant dense<0.000000e+00> : vector<8x8xf32>
    %13 = tpu.matmul %11, %12, %cst_10 {dimension_numbers = #tpu.dot_dimension_numbers<[1], [1], [0], [0], [0, 0, 1, 0], [], []>} : vector<8x32xbf16>, vector<8x32xbf16>, vector<8x8xf32> -> vector<8x8xf32>
    %cst_11 = arith.constant dense<0xFF800000> : vector<8xf32>
    %14 = vector.multi_reduction <maximumf>, %13, %cst_11 [1] : vector<8x8xf32> to vector<8xf32>
    %15 = vector.shape_cast %14 : vector<8xf32> to vector<8x1xf32>
    %16 = vector.broadcast %15 : vector<8x1xf32> to vector<8x8xf32>
    %17 = arith.subf %13, %16 : vector<8x8xf32>
    %18 = math.exp %17 : vector<8x8xf32>
    %cst_12 = arith.constant dense<0.000000e+00> : vector<8xf32>
    %19 = vector.multi_reduction <add>, %18, %cst_12 [1] : vector<8x8xf32> to vector<8xf32>
    %20 = vector.shape_cast %19 : vector<8xf32> to vector<8x1xf32>
    %21 = vector.broadcast %20 : vector<8x1xf32> to vector<8x8xf32>
    %22 = arith.divf %18, %21 : vector<8x8xf32>
    %23 = arith.truncf %22 : vector<8x8xf32> to vector<8x8xbf16>
    %24 = arith.truncf %10 : vector<8x32xf32> to vector<8x32xbf16>
    %cst_13 = arith.constant dense<0.000000e+00> : vector<8x32xf32>
    %25 = tpu.matmul %23, %24, %cst_13 {dimension_numbers = #tpu.dot_dimension_numbers<[1], [0], [0], [1], [0, 0, 1, 1], [], []>} : vector<8x8xbf16>, vector<8x32xbf16>, vector<8x32xf32> -> vector<8x32xf32>
    %c0_14 = arith.constant 0 : index
    %c0_15 = arith.constant 0 : index
    %26 = vector.load %arg1[%c0_14, %c0_15] : memref<8x32xf32, #tpu.memory_space<vmem>>, vector<8x32xf32>
    %27 = arith.addf %26, %25 : vector<8x32xf32>
    %c0_16 = arith.constant 0 : index
    %c0_17 = arith.constant 0 : index
    %28 = vector.load %arg4[%c0_16, %c0_17] : memref<8x32xf32, #tpu.memory_space<vmem>>, vector<8x32xf32>
    tpu.vector_store %arg4[%c0_16, %c0_17], %27 {strides = array<i32>} : memref<8x32xf32, #tpu.memory_space<vmem>>, vector<8x32xf32>,
    %c0_18 = arith.constant 0 : index
    %c0_19 = arith.constant 0 : index
    %29 = vector.load %arg2[%c0_18, %c0_19] : memref<16x32xf32, #tpu.memory_space<vmem>>, vector<16x32xf32>
    %30 = arith.truncf %29 : vector<16x32xf32> to vector<16x32xbf16>
    %cst_20 = arith.constant dense<0.000000e+00> : vector<16x32xf32>
    %31 = tpu.matmul %30, %1, %cst_20 {dimension_numbers = #tpu.dot_dimension_numbers<[1], [0], [0], [1], [0, 0, 1, 1], [], []>} : vector<16x32xbf16>, vector<32x32xbf16>, vector<16x32xf32> -> vector<16x32xf32>
    %cst_21 = arith.constant dense<0.000000e+00> : vector<16x32xf32>
    %32 = tpu.matmul %30, %3, %cst_21 {dimension_numbers = #tpu.dot_dimension_numbers<[1], [0], [0], [1], [0, 0, 1, 1], [], []>} : vector<16x32xbf16>, vector<32x32xbf16>, vector<16x32xf32> -> vector<16x32xf32>
    %cst_22 = arith.constant dense<0.000000e+00> : vector<16x32xf32>
    %33 = tpu.matmul %30, %5, %cst_22 {dimension_numbers = #tpu.dot_dimension_numbers<[1], [0], [0], [1], [0, 0, 1, 1], [], []>} : vector<16x32xbf16>, vector<32x32xbf16>, vector<16x32xf32> -> vector<16x32xf32>
    %34 = arith.truncf %31 : vector<16x32xf32> to vector<16x32xbf16>
    %35 = arith.truncf %32 : vector<16x32xf32> to vector<16x32xbf16>
    %cst_23 = arith.constant dense<0.000000e+00> : vector<16x16xf32>
    %36 = tpu.matmul %34, %35, %cst_23 {dimension_numbers = #tpu.dot_dimension_numbers<[1], [1], [0], [0], [0, 0, 1, 0], [], []>} : vector<16x32xbf16>, vector<16x32xbf16>, vector<16x16xf32> -> vector<16x16xf32>
    %cst_24 = arith.constant dense<0xFF800000> : vector<16xf32>
    %37 = vector.multi_reduction <maximumf>, %36, %cst_24 [1] : vector<16x16xf32> to vector<16xf32>
    %38 = vector.shape_cast %37 : vector<16xf32> to vector<16x1xf32>
    %39 = vector.broadcast %38 : vector<16x1xf32> to vector<16x16xf32>
    %40 = arith.subf %36, %39 : vector<16x16xf32>
    %41 = math.exp %40 : vector<16x16xf32>
    %cst_25 = arith.constant dense<0.000000e+00> : vector<16xf32>
    %42 = vector.multi_reduction <add>, %41, %cst_25 [1] : vector<16x16xf32> to vector<16xf32>
    %43 = vector.shape_cast %42 : vector<16xf32> to vector<16x1xf32>
    %44 = vector.broadcast %43 : vector<16x1xf32> to vector<16x16xf32>
    %45 = arith.divf %41, %44 : vector<16x16xf32>
    %46 = arith.truncf %45 : vector<16x16xf32> to vector<16x16xbf16>
    %47 = arith.truncf %33 : vector<16x32xf32> to vector<16x32xbf16>
    %cst_26 = arith.constant dense<0.000000e+00> : vector<16x32xf32>
    %48 = tpu.matmul %46, %47, %cst_26 {dimension_numbers = #tpu.dot_dimension_numbers<[1], [0], [0], [1], [0, 0, 1, 1], [], []>} : vector<16x16xbf16>, vector<16x32xbf16>, vector<16x32xf32> -> vector<16x32xf32>
    %c0_27 = arith.constant 0 : index
    %c0_28 = arith.constant 0 : index
    %49 = vector.load %arg2[%c0_27, %c0_28] : memref<16x32xf32, #tpu.memory_space<vmem>>, vector<16x32xf32>
    %50 = arith.addf %49, %48 : vector<16x32xf32>
    %c0_29 = arith.constant 0 : index
    %c0_30 = arith.constant 0 : index
    %51 = vector.load %arg5[%c0_29, %c0_30] : memref<16x32xf32, #tpu.memory_space<vmem>>, vector<16x32xf32>
    tpu.vector_store %arg5[%c0_29, %c0_30], %50 {strides = array<i32>} : memref<16x32xf32, #tpu.memory_space<vmem>>, vector<16x32xf32>,
    return
  }
  func.func @transform_0(%arg0: i32) -> (i32, i32) {
    %c0_i32 = arith.constant 0 : i32
    %c0_i32_0 = arith.constant 0 : i32
    %c0_i32_1 = arith.constant 0 : i32
    return %c0_i32, %c0_i32_0 : i32, i32
  }
  func.func @transform_1(%arg0: i32) -> (i32, i32) {
    %c0_i32 = arith.constant 0 : i32
    %c0_i32_0 = arith.constant 0 : i32
    %c0_i32_1 = arith.constant 0 : i32
    return %c0_i32, %c0_i32_0 : i32, i32
  }
  func.func @transform_2(%arg0: i32) -> (i32, i32, i32) {
    %c0_i32 = arith.constant 0 : i32
    %c0_i32_0 = arith.constant 0 : i32
    %c0_i32_1 = arith.constant 0 : i32
    %c0_i32_2 = arith.constant 0 : i32
    return %c0_i32, %c0_i32_0, %c0_i32_1 : i32, i32, i32
  }
  func.func @transform_3(%arg0: i32) -> (i32, i32) {
    %c0_i32 = arith.constant 0 : i32
    %c0_i32_0 = arith.constant 0 : i32
    %c0_i32_1 = arith.constant 0 : i32
    return %c0_i32, %c0_i32_0 : i32, i32
  }
  func.func @transform_4(%arg0: i32) -> (i32, i32) {
    %c0_i32 = arith.constant 0 : i32
    %c0_i32_0 = arith.constant 0 : i32
    %c0_i32_1 = arith.constant 0 : i32
    return %c0_i32, %c0_i32_0 : i32, i32
  }
}

</mosaic_0001>

<bundles_post_ra>
// kernel: tpu_custom_call.1
= control target key start
LH: loop header
LB: loop body
LE: loop exit
PB: predicated region body
PF: predicated region fallthrough
CT: control target
= control target key end

     0   :  { %10 = vsyncpa [#allocation3], 0  ;;  %s1069_s0 = inlined_call_operand.hbm [shape: f32[8,32], index: 0, kind: input, shape index: {}]   ;;  %s1070_s1 = inlined_call_operand.hbm [shape: f32[16,32], index: 1, kind: input, shape index: {}]   ;;  %s1071_s2 = inlined_call_operand.hbm [shape: bf16[3,32,32], index: 2, kind: input, shape index: {}]   ;;  %s1072_s3 = inlined_call_operand.hbm [shape: f32[8,32], index: 3, kind: output, shape index: {0}]   ;;  %s1073_s4 = inlined_call_operand.hbm [shape: f32[16,32], index: 4, kind: output, shape index: {1}]  }
   0x1   :  { %11 = vsyncpa [#allocation6], 0 }
   0x2   :  { %12 = vsyncpa [#allocation4], 0 }
   0x3   :  { %13 = vsyncpa [#allocation10], 0  ;;  %s889_s15 = smov [#allocation5]   ;;  %s771_s19 = scalar_lea.hbm %s1070_s1, 256 }
   0x4   :  { %s29_s16 = sshll.u32 %s889_s15, 4  ;;  %p772_p0 = scmp.ne.s32.totalorder %s1070_s1, %s771_s19  ;;  %s30_s16 = int_to_ptr.vmem [resolvable:$true] %s29_s16 }
   0x5   :  { %p775_p1 = scmp.lt.u32.totalorder %s771_s19, %s1070_s1 }
   0x7   :  { %p777_p2 = pnand %p775_p1, %p772_p0 }
   0x9   :  { %780 = shalt.err (!%p777_p2)
}
   0xa   :  { %s781_s24 = scalar_lea.vmem %s30_s16, 256  ;;  %p786_p4 = scmp.lt.s32.totalorder %s30_s16, %s30_s16 }
   0xb   :  { %p782_p3 = scmp.ne.s32.totalorder %s30_s16, %s781_s24  ;;  %p787_p5 = scmp.lt.s32.totalorder %s781_s24, %s781_s24 }
   0xd   :  { %p788_p6 = por %p787_p5, %p786_p4 }
   0xf   :  { %p789_p7 = pnand %p788_p6, %p782_p3 }
  0x11   :  { %792 = shalt.err (!%p789_p7)
}
  0x12   :  { %s890_s25 = smov 128   ;;  %s891_s26 = smov 8  }
  0x13   :  { %35 = dma.hbm_to_vmem [thread:$0]  %s1070_s1, 256, %s30_s16, [#allocation6], %s890_s25, %s890_s25, %s891_s26  }
  0x14   :  { %s892_s29 = smov [#allocation2]   ;;  %s893_s5 = smov [#allocation7]  }
  0x15   :  { %s20_s30 = sshll.u32 %s892_s29, 4  ;;  %s41_s6 = sshll.u32 %s893_s5, 4  ;;  %s21_s30 = int_to_ptr.vmem [resolvable:$true] %s20_s30  ;;  %s42_s6 = int_to_ptr.vmem [resolvable:$true] %s41_s6 }
  0x16   :  { %s793_s9 = scalar_lea.hbm %s1069_s0, 128 }
  0x17   :  { %p794_p8 = scmp.ne.s32.totalorder %s1069_s0, %s793_s9  ;;  %p797_p9 = scmp.lt.u32.totalorder %s793_s9, %s1069_s0 }
  0x19   :  { %p799_p10 = pnand %p797_p9, %p794_p8 }
  0x1b   :  { %802 = shalt.err (!%p799_p10)
}
  0x1c   :  { %s803_s1 = scalar_lea.vmem %s21_s30, 128  ;;  %p808_p12 = scmp.lt.s32.totalorder %s21_s30, %s21_s30 }
  0x1d   :  { %p804_p11 = scmp.ne.s32.totalorder %s21_s30, %s803_s1  ;;  %p809_p13 = scmp.lt.s32.totalorder %s803_s1, %s803_s1 }
  0x1f   :  { %p810_p0 = por %p809_p13, %p808_p12 }
  0x21   :  { %p811_p1 = pnand %p810_p0, %p804_p11 }
  0x23   :  { %814 = shalt.err (!%p811_p1)
}
  0x24   :  { %23 = dma.hbm_to_vmem [thread:$0]  %s1069_s0, 128, %s21_s30, [#allocation3]  }
  0x25   :  { %s815_s18 = scalar_lea.hbm %s1071_s2, 768 }
  0x26   :  { %p816_p2 = scmp.ne.s32.totalorder %s1071_s2, %s815_s18  ;;  %p819_p3 = scmp.lt.u32.totalorder %s815_s18, %s1071_s2 }
  0x28   :  { %p821_p4 = pnand %p819_p3, %p816_p2 }
  0x2a   :  { %824 = shalt.err (!%p821_p4)
}
  0x2b   :  { %s825_s23 = scalar_lea.vmem %s42_s6, 768  ;;  %p830_p6 = scmp.lt.s32.totalorder %s42_s6, %s42_s6 }
  0x2c   :  { %p826_p5 = scmp.ne.s32.totalorder %s42_s6, %s825_s23  ;;  %p831_p7 = scmp.lt.s32.totalorder %s825_s23, %s825_s23 }
  0x2e   :  { %p832_p8 = por %p831_p7, %p830_p6 }
  0x30   :  { %p833_p9 = pnand %p832_p8, %p826_p5 }
  0x32   :  { %836 = shalt.err (!%p833_p9)
}
  0x33   :  { %s894_s0 = smov 64   ;;  %s895_s24 = smov 4  }
  0x34   :  { %47 = dma.hbm_to_vmem [thread:$0]  %s1071_s2, 768, %s42_s6, [#allocation6], %s894_s0, %s894_s0, %s895_s24  }
  0x35   :  { %881 = dma.done.wait [#allocation3], 128  }
  0x36   :  { %882 = vsyncadd [#allocation3], 4294967168 }
  0x37   :  { %883 = dma.done.wait [#allocation6], 1024  }
  0x38   :  { %884 = vsyncadd [#allocation6], 4294966272  ;;  %v896_v0 = vmov 0.0   ;;  %vm897_vm0 = vmmov 0   ;;  %v970_v1 = vld [vmem:[#allocation7 + $0x10] sm:$0xff]   ;;  %v972_v2 = vld [vmem:[#allocation7 + $0x18] sm:$0xff]  }
  0x39   :  { %678 = vmatprep.subr.bf16.mxu1 %v896_v0  ;;  %670 = vmatprep.subr.bf16.mxu0 %v896_v0  ;;  %v755_v3 = vld [vmem:[#allocation7] sm:$0xff]   ;;  %v976_v4 = vld [vmem:[#allocation2] sm:$0xff]  ;;  %vm86_vm1 = vcmask 261120   ;;  %vm282_vm2 = vcmask 64512   ;;  %vm299_vm3 = vcmask 1043456   ;;  %v1005_v36 = vld [vmem:[#allocation5] sm:$0xff] }
  0x3a   :  { %682 = vmatprep.mubr.msk.bf16.mxu1 %vm897_vm0, %v896_v0  ;;  %674 = vmatprep.mubr.msk.bf16.mxu0 %vm897_vm0, %v896_v0  ;;  %v756_v5 = vld [vmem:[#allocation7 + $0x8] sm:$0xff]   ;;  %v73_v6 = vpack.c.bf16 %v976_v4, %v976_v4  ;;  %v757_v18 = vld [vmem:[#allocation7 + $0x20] sm:$0xff]   ;;  %v1007_v37 = vld [vmem:[#allocation5 + $0x8] sm:$0xff]  ;;  %vm523_vm4 = vcmask 130048   ;;  %s898_s2 = smov [#allocation8]  }
  0x3b   :  { %679 = vmatpush3.bf16.msra.mxu1 %v970_v1  ;;  %671 = vmatpush3.bf16.msra.mxu0 %v755_v3  ;;  %v758_v19 = vld [vmem:[#allocation7 + $0x28] sm:$0xff]   ;;  %v347_v38 = vpack.c.bf16 %v1007_v37, %v1005_v36  ;;  %s602_s29 = sshll.u32 %s898_s2, 4  ;;  %s603_s29 = int_to_ptr.vmem [resolvable:$true] %s602_s29 }
  0x3c   :  { %680 = vmatprep.subr.bf16.mxu1 %v896_v0  ;;  %672 = vmatprep.subr.bf16.mxu0 %v896_v0  ;;  %s837_s30 = scalar_lea.vmem %s603_s29, 128  ;;  %p842_p11 = scmp.lt.s32.totalorder %s603_s29, %s603_s29 }
  0x3d   :  { %p838_p10 = scmp.ne.s32.totalorder %s603_s29, %s837_s30  ;;  %p843_p12 = scmp.lt.s32.totalorder %s837_s30, %s837_s30 }
  0x3f   :  { %681 = vmatpush3.bf16.msra.mxu1 %v972_v2  ;;  %673 = vmatpush3.bf16.msra.mxu0 %v756_v5  ;;  %p844_p13 = por %p843_p12, %p842_p11 }
  0x40   :  { %694 = vmatprep.subr.bf16.mxu1 %v896_v0  ;;  %686 = vmatprep.subr.bf16.mxu0 %v896_v0 }
  0x41   :  { %p845_p0 = pnand %p844_p13, %p838_p10 }
  0x42   :  { %683 = vmatmul.mubr.msk.bf16.vlgmr.msra.gmra.mrb[0].mxu1 %vm86_vm1, %v73_v6  ;;  %675 = vmatmul.mubr.msk.bf16.vlgmr.msra.gmra.mrb[0].mxu0 %vm86_vm1, %v73_v6 }
  0x43   :  { %696 = vmatprep.mubr.msk.bf16.mxu1 %vm897_vm0, %v896_v0  ;;  %690 = vmatprep.mubr.msk.bf16.mxu0 %vm897_vm0, %v896_v0 }
  0x44   :  { %687 = vmatpush3.bf16.msra.mxu0 %v757_v18 }
  0x45   :  { %688 = vmatprep.subr.bf16.mxu0 %v896_v0 }
  0x48   :  { %689 = vmatpush3.bf16.msra.mxu0 %v758_v19 }
  0x49   :  { %700 = vmatprep.subr.bf16.mxu0 %v896_v0 }
  0x4b   :  { %691 = vmatmul.mubr.msk.bf16.vlgmr.msra.gmra.mrb[4].mxu0 %vm86_vm1, %v73_v6 }
  0x4c   :  { %702 = vmatprep.mubr.msk.bf16.mxu0 %vm897_vm0, %v896_v0 }
 0x115   :  { %v176_v7 = vpop.f32.mrb[0].mxu1  ;;  %v124_v11 = vpop.f32.mrb[0].mxu0 }
 0x116   :  { %v235_v8 = vpack.c.bf16 %v176_v7, %v176_v7  ;;  %v684_v9 = vpop.f32.mrb[1].mxu1  ;;  %v676_v14 = vpop.f32.mrb[1].mxu0  ;;  %v234_v17 = vpack.c.bf16 %v124_v11, %v124_v11 }
 0x117   :  { %v179_v10 = vpop.f32.mrb[2].mxu1  ;;  %v127_v15 = vpop.f32.mrb[2].mxu0 }
 0x118   :  { %v240_v12 = vsel %vm86_vm1, %v235_v8, 0  ;;  %v685_v13 = vpop.f32.mrb[3].mxu1  ;;  %v677_v16 = vpop.f32.mrb[3].mxu0 }
 0x119   :  { %695 = vmatpush3.bf16.xpose.msra.mxu1 %v240_v12 }
 0x11a   :  { %706 = vmatprep.subr.bf16.mxu1 %v896_v0 }
 0x11e   :  { %v228_v30 = vpop.f32.mrb[4].mxu0 }
 0x11f   :  { %v692_v31 = vpop.f32.mrb[5].mxu0  ;;  %v295_v34 = vpack.c.bf16 %v228_v30, %v228_v30 }
 0x120   :  { %697 = vmatmul.mubr.msk.bf16.vlgmr.msra.gmra.mrb[4].mxu1 %vm86_vm1, %v234_v17  ;;  %v231_v32 = vpop.f32.mrb[6].mxu0 }
 0x121   :  { %707 = vmatpush3.bf16.msra.mxu1 %v755_v3  ;;  %710 = vmatprep.mubr.msk.bf16.mxu1 %vm897_vm0, %v896_v0  ;;  %v693_v33 = vpop.f32.mrb[7].mxu0  ;;  %v301_v35 = vsel %vm299_vm3, %v295_v34, 0 }
 0x122   :  { %708 = vmatprep.subr.bf16.mxu1 %v896_v0  ;;  %701 = vmatpush3.bf16.msra.mxu0 %v301_v35 }
 0x123   :  { %714 = vmatprep.subr.bf16.mxu0 %v896_v0 }
 0x125   :  { %709 = vmatpush3.bf16.msra.mxu1 %v756_v5 }
 0x126   :  { %722 = vmatprep.subr.bf16.mxu1 %v896_v0 }
 0x128   :  { %711 = vmatmul.mubr.msk.bf16.vlgmr.msra.gmra.mrb[8].mxu1 %vm86_vm1, %v347_v38 }
 0x129   :  { %723 = vmatpush3.bf16.msra.mxu1 %v757_v18  ;;  %726 = vmatprep.mubr.msk.bf16.mxu1 %vm897_vm0, %v896_v0 }
 0x12a   :  { %724 = vmatprep.subr.bf16.mxu1 %v896_v0 }
 0x12d   :  { %725 = vmatpush3.bf16.msra.mxu1 %v758_v19 }
 0x12e   :  { %736 = vmatprep.subr.bf16.mxu1 %v896_v0 }
 0x130   :  { %727 = vmatmul.mubr.msk.bf16.vlgmr.msra.gmra.mrb[12].mxu1 %vm86_vm1, %v347_v38 }
 0x131   :  { %738 = vmatprep.mubr.msk.bf16.mxu1 %vm897_vm0, %v896_v0 }
 0x1f3   :  { %v276_v20 = vpop.f32.mrb[4].mxu1 }
 0x1f4   :  { %v698_v21 = vpop.f32.mrb[5].mxu1  ;;  %v283_v22 = vsel %vm282_vm2, %v276_v20, -inf }
 0x1f5   :  { %284 = vmax.xlane.f32.xlu0 %v283_v22  ;;  %v279_v23 = vpop.f32.mrb[6].mxu1 }
 0x1f6   :  { %v699_v24 = vpop.f32.mrb[7].mxu1 }
 0x1fb   :  { %v385_v43 = vpop.f32.mrb[8].mxu1 }
 0x1fc   :  { %v712_v44 = vpop.f32.mrb[9].mxu1 }
 0x1fd   :  { %v388_v45 = vpop.f32.mrb[10].mxu1 }
 0x1fe   :  { %v474_v46 = vpack.c.bf16 %v388_v45, %v385_v43  ;;  %v713_v47 = vpop.f32.mrb[11].mxu1 }
 0x203   :  { %v467_v11 = vpop.f32.mrb[12].mxu1 }
 0x204   :  { %v728_v12 = vpop.f32.mrb[13].mxu1 }
 0x205   :  { %v470_v13 = vpop.f32.mrb[14].mxu1 }
 0x206   :  { %v729_v14 = vpop.f32.mrb[15].mxu1  ;;  %v547_v15 = vpack.c.bf16 %v470_v13, %v467_v11 }
 0x208   :  { %737 = vmatpush3.bf16.msra.mxu1 %v547_v15 }
 0x282   :  { %v285_v25 = vpop.xlane.xlu0 %284 }
 0x283   :  { %v286_v26 = vsub.f32 %v276_v20, %v285_v25 }
 0x285   :  { %v287_v27 = vmul.f32 1.442695, %v286_v26 }
 0x287   :  { %759 = vpow2.f32 %v287_v27 }
 0x291   :  { %v760_v28 = vpop.eup %759 }
 0x292   :  { %v289_v29 = vsel %vm282_vm2, %v760_v28, 0.0 }
 0x293   :  { %290 = vadd.xlane.f32.xlu0 %v289_v29 }
 0x320   :  { %v291_v39 = vpop.xlane.xlu0 %290 }
 0x321   :  { %761 = vrcp.f32 %v291_v39 }
 0x32b   :  { %v762_v40 = vpop.eup %761 }
 0x32c   :  { %v293_v41 = vmul.f32 %v762_v40, %v760_v28 }
 0x32e   :  { %v294_v42 = vpack.c.bf16 %v293_v41, %v293_v41 }
 0x330   :  { %703 = vmatmul.mubr.msk.bf16.vlgmr.msra.gmra.mrb[8].mxu0 %vm282_vm2, %v294_v42 }
 0x331   :  { %715 = vmatpush3.bf16.msra.mxu0 %v970_v1  ;;  %718 = vmatprep.mubr.msk.bf16.mxu0 %vm897_vm0, %v896_v0 }
 0x332   :  { %716 = vmatprep.subr.bf16.mxu0 %v896_v0 }
 0x335   :  { %717 = vmatpush3.bf16.msra.mxu0 %v972_v2 }
 0x336   :  { %730 = vmatprep.subr.bf16.mxu0 %v896_v0 }
 0x338   :  { %719 = vmatmul.mubr.msk.bf16.vlgmr.msra.gmra.mrb[12].mxu0 %vm86_vm1, %v347_v38 }
 0x339   :  { %732 = vmatprep.mubr.msk.bf16.mxu0 %vm897_vm0, %v896_v0 }
 0x403   :  { %v337_v48 = vpop.f32.mrb[8].mxu0 }
 0x404   :  { %v343_v49 = vadd.f32 %v337_v48, %v976_v4  ;;  %v704_v50 = vpop.f32.mrb[9].mxu0 }
 0x405   :  { %v340_v51 = vpop.f32.mrb[10].mxu0 }
 0x406   :  { %344 = vst.msk [vmem:[#allocation8] sm:$0xff] %vm86_vm1, %v343_v49  ;;  %v705_v52 = vpop.f32.mrb[11].mxu0 }
 0x40b   :  { %v426_v53 = vpop.f32.mrb[12].mxu0 }
 0x40c   :  { %v720_v54 = vpop.f32.mrb[13].mxu0 }
 0x40d   :  { %v429_v55 = vpop.f32.mrb[14].mxu0 }
 0x40e   :  { %v475_v56 = vpack.c.bf16 %v429_v55, %v426_v53  ;;  %v721_v57 = vpop.f32.mrb[15].mxu0 }
 0x410   :  { %v480_v58 = vsel %vm86_vm1, %v475_v56, 0 }
 0x411   :  { %731 = vmatpush3.bf16.xpose.msra.mxu0 %v480_v58 }
 0x418   :  { %733 = vmatmul.mubr.msk.bf16.vlgmr.msra.gmra.mrb[16].mxu0 %vm86_vm1, %v474_v46 }
 0x4eb   :  { %v516_v59 = vpop.f32.mrb[16].mxu0 }
 0x4ec   :  { %v734_v60 = vpop.f32.mrb[17].mxu0  ;;  %v524_v61 = vsel %vm523_vm4, %v516_v59, -inf }
 0x4ed   :  { %525 = vmax.xlane.f32.xlu1 %v524_v61  ;;  %v519_v62 = vpop.f32.mrb[18].mxu0 }
 0x4ee   :  { %v735_v63 = vpop.f32.mrb[19].mxu0  ;;  %v527_v0 = vsel %vm523_vm4, %v519_v62, -inf }
 0x4f1   :  { %528 = vmax.xlane.f32.xlu1 %v527_v0 }
 0x57a   :  { %v526_v1 = vpop.xlane.xlu1 %525 }
 0x57b   :  { %v530_v2 = vsub.f32 %v516_v59, %v526_v1 }
 0x57d   :  { %v532_v3 = vmul.f32 1.442695, %v530_v2 }
 0x57e   :  { %v529_v4 = vpop.xlane.xlu1 %528 }
 0x57f   :  { %763 = vpow2.f32 %v532_v3  ;;  %v531_v5 = vsub.f32 %v519_v62, %v529_v4 }
 0x581   :  { %v534_v6 = vmul.f32 1.442695, %v531_v5 }
 0x583   :  { %765 = vpow2.f32 %v534_v6 }
 0x589   :  { %v764_v7 = vpop.eup %763 }
 0x58a   :  { %v536_v8 = vsel %vm523_vm4, %v764_v7, 0.0 }
 0x58b   :  { %537 = vadd.xlane.f32.xlu0 %v536_v8 }
 0x58d   :  { %v766_v9 = vpop.eup %765 }
 0x58e   :  { %v539_v10 = vsel %vm523_vm4, %v766_v9, 0.0 }
 0x58f   :  { %540 = vadd.xlane.f32.xlu1 %v539_v10 }
 0x618   :  { %v538_v16 = vpop.xlane.xlu0 %537 }
 0x619   :  { %767 = vrcp.f32 %v538_v16 }
 0x61c   :  { %v541_v17 = vpop.xlane.xlu1 %540 }
 0x61d   :  { %769 = vrcp.f32 %v541_v17 }
 0x623   :  { %v768_v18 = vpop.eup %767 }
 0x624   :  { %v543_v20 = vmul.f32 %v768_v18, %v764_v7 }
 0x627   :  { %v770_v19 = vpop.eup %769 }
 0x628   :  { %v545_v21 = vmul.f32 %v770_v19, %v766_v9 }
 0x62a   :  { %v546_v22 = vpack.c.bf16 %v545_v21, %v543_v20 }
 0x62c   :  { %739 = vmatmul.mubr.msk.bf16.vlgmr.msra.gmra.mrb[16].mxu1 %vm523_vm4, %v546_v22 }
 0x62d   :  { %848 = shalt.err (!%p845_p0)
}
 0x62e   :  { %s849_s7 = scalar_lea.hbm %s1072_s3, 128 }
 0x62f   :  { %p850_p1 = scmp.ne.s32.totalorder %s1072_s3, %s849_s7  ;;  %p853_p2 = scmp.lt.u32.totalorder %s849_s7, %s1072_s3 }
 0x631   :  { %p855_p3 = pnand %p853_p2, %p850_p1 }
 0x633   :  { %858 = shalt.err (!%p855_p3)
}
 0x634   :  { %605 = dma.vmem_to_hbm [thread:$0]  %s603_s29, 128, %s1072_s3, [#allocation4]  }
 0x635   :  { %s899_s1 = smov [#allocation9]  }
 0x636   :  { %s611_s14 = sshll.u32 %s899_s1, 4  ;;  %s612_s14 = int_to_ptr.vmem [resolvable:$true] %s611_s14 }
 0x637   :  { %s859_s15 = scalar_lea.vmem %s612_s14, 256  ;;  %p864_p5 = scmp.lt.s32.totalorder %s612_s14, %s612_s14 }
 0x638   :  { %p860_p4 = scmp.ne.s32.totalorder %s612_s14, %s859_s15  ;;  %p865_p6 = scmp.lt.s32.totalorder %s859_s15, %s859_s15 }
 0x63a   :  { %p866_p7 = por %p865_p6, %p864_p5 }
 0x63c   :  { %p867_p8 = pnand %p866_p7, %p860_p4 }
 0x6ff   :  { %v585_v23 = vpop.f32.mrb[16].mxu1 }
 0x700   :  { %v592_v24 = vadd.f32 %v585_v23, %v1005_v36  ;;  %v740_v25 = vpop.f32.mrb[17].mxu1 }
 0x701   :  { %v588_v26 = vpop.f32.mrb[18].mxu1 }
 0x702   :  { %594 = vst.msk [vmem:[#allocation9] sm:$0xff] %vm86_vm1, %v592_v24  ;;  %v593_v27 = vadd.f32 %v588_v26, %v1007_v37  ;;  %v741_v28 = vpop.f32.mrb[19].mxu1 }
 0x704   :  { %595 = vst.msk [vmem:[#allocation9 + $0x8] sm:$0xff] %vm86_vm1, %v593_v27 }
 0x705   :  { %870 = shalt.err (!%p867_p8)
}
 0x706   :  { %s871_s17 = scalar_lea.hbm %s1073_s4, 256 }
 0x707   :  { %p872_p9 = scmp.ne.s32.totalorder %s1073_s4, %s871_s17  ;;  %p875_p10 = scmp.lt.u32.totalorder %s871_s17, %s1073_s4 }
 0x709   :  { %p877_p11 = pnand %p875_p10, %p872_p9 }
 0x70b   :  { %880 = shalt.err (!%p877_p11)
}
 0x70c   :  { %617 = dma.vmem_to_hbm [thread:$0]  %s612_s14, 256, %s1073_s4, [#allocation10], %s890_s25, %s890_s25, %s891_s26  }
 0x70d   :  { %885 = dma.done.wait [#allocation4], 128  }
 0x70e   :  { %886 = vsyncadd [#allocation4], 4294967168 }
 0x70f   :  { %887 = dma.done.wait [#allocation10], 256  }
 0x710   :  { %888 = vsyncadd [#allocation10], 4294967040 }
 0x711   :  { %624 = vsyncpa [#allocation3], 1 }
 0x712   :  { %625 = vsyncpa [#allocation6], 1 }
 0x713   :  { %626 = vsyncpa [#allocation4], 1 }
 0x714   :  { %627 = vsyncpa [#allocation10], 1 }

</bundles_post_ra>
